<compile_context>
chip_gen: v7x
topology: tpu7x:2x2x1
jax: 0.10.0
libtpu: 0.0.40
codegen_flags: <defaults>
</compile_context>

<pallas_src>
import functools

import jax
import jax.numpy as jnp
from jax.experimental import pallas as pl
from jax.experimental.pallas import tpu as pltpu


def _round_up(x, m):
    return ((x + m - 1) // m) * m


def _vmem_capacity_bytes():
    # Generation-aware VMEM size (128 MiB on v5e/v6e, 64 MiB per TC on v7x).
    try:
        return int(pltpu.get_tpu_info().vmem_capacity_bytes)
    except Exception:
        return 64 * 1024 * 1024  # conservative fallback (v7x per-TC)


# ----------------------------------------------------------------------------
# Path A: lane-dense layout for small class counts (batch on the lane axis).
# ----------------------------------------------------------------------------
def _loss_eq9_lane_kernel(xT_ref, t_ref, out_ref, *, j, batch_size, block_cols):
    # xT_ref: [C, TBL] native dtype   t_ref: [1, TBL] i32   out_ref: [1, TBL] f32
    x = xT_ref[...].astype(jnp.float32)          # cast in VMEM, not in HBM
    t = t_ref[...]                               # [1, TBL]
    C, TBL = x.shape

    row = jax.lax.broadcasted_iota(jnp.int32, (C, TBL), 0)
    is_target = row == t                         # one True per valid column

    # delta = (x - j) at the target class, 0 elsewhere
    # vals  = delta - x  ->  -j at target, -x elsewhere (eq. 9 value set)
    delta = jnp.where(is_target, x - j, 0.0)
    vals = delta - x
    y_correct = jnp.sum(delta, axis=0, keepdims=True) + j      # [1, TBL]

    m = jnp.max(vals, axis=0, keepdims=True)                   # cheap <=C-sublane reduce
    lse = m + jnp.log(jnp.sum(jnp.exp(vals - m), axis=0, keepdims=True))
    per_sample = y_correct + lse                               # [1, TBL]

    # Mask lanes of the ragged final block (garbage columns -> 0).
    col0 = pl.program_id(0) * block_cols
    cols = col0 + jax.lax.broadcasted_iota(jnp.int32, (1, TBL), 1)
    out_ref[...] = jnp.where(cols < batch_size, per_sample, 0.0)


def _loss_eq9_lane_path(outputs, targets, j, B, C):
    # Batch on the lane axis: tiny transpose copy is negligible in the small-C,
    # compute-bound regime and buys ~10x fewer exp/XLU ops per sample.
    xT = outputs.T                                # (C, B), native dtype
    t = targets.reshape(1, B)

    TBL = min(8 * 128, _round_up(B, 128))         # big lane tiles, ragged last block
    num_blocks = pl.cdiv(B, TBL)

    kernel = functools.partial(
        _loss_eq9_lane_kernel, j=float(j), batch_size=B, block_cols=TBL)

    per_sample = pl.pallas_call(
        kernel,
        out_shape=jax.ShapeDtypeStruct((1, B), jnp.float32),
        grid=(num_blocks,),
        in_specs=[
            pl.BlockSpec((C, TBL), lambda i: (0, i)),   # logits (classes x batch)
            pl.BlockSpec((1, TBL), lambda i: (0, i)),   # targets
        ],
        out_specs=pl.BlockSpec((1, TBL), lambda i: (0, i)),
        compiler_params=pltpu.CompilerParams(
            dimension_semantics=("parallel",),
            vmem_limit_bytes=16 * 1024 * 1024,
        ),
    )(xT, t)

    return jnp.sum(per_sample) * jnp.float32(1.0 / B)


# ----------------------------------------------------------------------------
# Path B: row-major layout for larger class counts (classes on the lane axis).
# ----------------------------------------------------------------------------
def _loss_eq9_row_kernel(x_ref, t_ref, part_ref, *, j, batch_size, block_rows):
    # x_ref: [TB, C] native dtype   t_ref: [TB, 1] i32   part_ref: [1, 8, 128] f32
    x = x_ref[...].astype(jnp.float32)            # cast in VMEM, not in HBM
    t = t_ref[...]
    TB, C = x.shape

    col = jax.lax.broadcasted_iota(jnp.int32, (TB, C), 1)
    is_target = col == t

    delta = jnp.where(is_target, x - j, 0.0)
    vals = delta - x
    y_correct = jnp.sum(delta, axis=1, keepdims=True) + j       # [TB, 1]

    m = jnp.max(vals, axis=1, keepdims=True)
    lse = m + jnp.log(jnp.sum(jnp.exp(vals - m), axis=1, keepdims=True))
    per_sample = y_correct + lse                                # [TB, 1]

    # Mask rows of the ragged final block (garbage rows -> 0).  This mask is
    # what makes running over the un-padded array safe.
    row0 = pl.program_id(0) * block_rows
    rows = row0 + jax.lax.broadcasted_iota(jnp.int32, (TB, 1), 0)
    per_sample = jnp.where(rows < batch_size, per_sample, 0.0)

    # One cross-sublane reduce per block; lane-dense (8,128) splat -> unmasked vst.
    part_ref[...] = jnp.broadcast_to(jnp.sum(per_sample), (1, 8, 128))


def _loss_eq9_row_path(outputs, targets, j, B, C, block_rows):
    itemsize = jnp.dtype(outputs.dtype).itemsize
    mult = max(8, 32 // max(1, itemsize))         # f32: 8, bf16: 16, int8/fp8: 32
    C_pad = _round_up(C, 128)                     # lane padding of the logits tile

    cap = _vmem_capacity_bytes()
    # Per-row VMEM estimate: double-buffered logits + targets tiles plus ~3
    # full-tile f32 temporaries (cast/delta/exp).  Keep it within ~45% of VMEM.
    per_row = 2 * (C_pad * itemsize + 512) + 3 * C_pad * 4
    tb_cap = max(mult, (int(0.45 * cap) // per_row) // mult * mult)

    if block_rows is None:
        TB = min(1024, tb_cap, _round_up(B, mult))
    else:
        TB = max(mult, _round_up(int(block_rows), mult))
        TB = min(TB, tb_cap)                      # clamp user value to VMEM budget

    num_blocks = pl.cdiv(B, TB)
    targets2d = targets.reshape(B, 1)

    vmem_limit = int(min(cap // 2, max(8 * 1024 * 1024, 2 * TB * per_row)))

    kernel = functools.partial(
        _loss_eq9_row_kernel, j=float(j), batch_size=B, block_rows=TB)

    partials = pl.pallas_call(
        kernel,
        out_shape=jax.ShapeDtypeStruct((num_blocks, 8, 128), jnp.float32),
        grid=(num_blocks,),
        in_specs=[
            pl.BlockSpec((TB, C), lambda i: (i, 0)),    # logits tile (native dtype)
            pl.BlockSpec((TB, 1), lambda i: (i, 0)),    # targets tile
        ],
        out_specs=pl.BlockSpec((1, 8, 128), lambda i: (i, 0, 0)),
        compiler_params=pltpu.CompilerParams(
            dimension_semantics=("parallel",),          # per-block partials
            vmem_limit_bytes=vmem_limit,
        ),
    )(outputs, targets2d)

    # Second-stage reduction + single 1/B normalization outside the kernel.
    return jnp.sum(partials[:, 0, 0]) * jnp.float32(1.0 / B)


# ----------------------------------------------------------------------------
# Public entry point.
# ----------------------------------------------------------------------------
def custom_loss_eq9(outputs, targets, j=0.1, block_rows=None, lane_dense=None):
    """outputs: [B, C] float (any float dtype), targets: [B] int in [0, C)."""
    B, C = outputs.shape
    targets = targets.astype(jnp.int32)
    if lane_dense is None:
        lane_dense = C <= 32                     # tiny C -> lane-dense layout
    if lane_dense:
        return _loss_eq9_lane_path(outputs, targets, j, B, C)
    return _loss_eq9_row_path(outputs, targets, j, B, C, block_rows)


def _reference(outputs, targets, j=0.1):
    # Pure-JAX reference mirroring the PyTorch code path exactly.
    outputs = outputs.astype(jnp.float32)
    B, C = outputs.shape
    t = targets.astype(jnp.int32)
    y_correct = outputs[jnp.arange(B), t]
    col = jnp.arange(C)[None, :]
    is_t = col == t[:, None]
    vals = jnp.where(is_t, -jnp.float32(j), -outputs)
    lse = jax.scipy.special.logsumexp(vals, axis=1)
    return jnp.mean(y_correct + lse)


if __name__ == "__main__":
    key = jax.random.PRNGKey(0)
    k1, k2, k3, k4, k5, k6 = jax.random.split(key, 6)

    # Case 1: LeNet-5 style shapes (B=8, C=10) -> lane-dense small-C path.
    B, C = 8, 10
    outputs = jax.random.normal(k1, (B, C), dtype=jnp.float32)
    targets = jax.random.randint(k2, (B,), 0, C, dtype=jnp.int32)
    loss = custom_loss_eq9(outputs, targets, j=0.1)
    jax.block_until_ready(loss)
    ref = _reference(outputs, targets, j=0.1)
    assert jnp.allclose(loss, ref, atol=1e-5, rtol=1e-5), (loss, ref)

    # Case 2: non-multiple-of-8 batch, forced row-major path with a small tile
    # -> exercises the multi-block grid, ragged final block masking (no pad)
    #    and the two-stage partial reduction.
    B2, C2 = 20, 10
    outputs2 = jax.random.normal(k3, (B2, C2), dtype=jnp.float32)
    targets2 = jax.random.randint(k4, (B2,), 0, C2, dtype=jnp.int32)
    loss2 = custom_loss_eq9(outputs2, targets2, j=0.1, block_rows=8,
                            lane_dense=False)
    jax.block_until_ready(loss2)
    ref2 = _reference(outputs2, targets2, j=0.1)
    assert jnp.allclose(loss2, ref2, atol=1e-5, rtol=1e-5), (loss2, ref2)

    # Case 3: bf16 logits with larger C -> native-dtype HBM read, in-kernel
    # f32 cast, row tile rounded to the bf16 sublane multiple (16).
    B3, C3 = 24, 160
    outputs3 = jax.random.normal(k5, (B3, C3), dtype=jnp.float32).astype(jnp.bfloat16)
    targets3 = jax.random.randint(k6, (B3,), 0, C3, dtype=jnp.int32)
    loss3 = custom_loss_eq9(outputs3, targets3, j=0.1)
    jax.block_until_ready(loss3)
    ref3 = _reference(outputs3, targets3, j=0.1)
    assert jnp.allclose(loss3, ref3, atol=1e-4, rtol=1e-4), (loss3, ref3)

    print("KERNEL_OK")
</pallas_src>

<mosaic_0001>
module attributes {stable_mosaic.version = 11 : i64} {
  func.func @_loss_eq9_lane_kernel(%arg0: i32, %arg1: memref<10x128xf32, #tpu.memory_space<vmem>>, %arg2: memref<1x128xi32, #tpu.memory_space<vmem>>, %arg3: memref<1x128xf32, #tpu.memory_space<vmem>>) attributes {dimension_semantics = [#tpu.dimension_semantics<parallel>], iteration_bounds = array<i64: 1>, scalar_prefetch = 0 : i64, scratch_operands = 0 : i64, tpu.core_type = #tpu.core_type<tc>, window_params = [{transform_indices = @transform_0, window_bounds = array<i64: 10, 128>}, {transform_indices = @transform_1, window_bounds = array<i64: 1, 128>}, {transform_indices = @transform_2, window_bounds = array<i64: 1, 128>}]} {
    %c0 = arith.constant 0 : index
    %c0_0 = arith.constant 0 : index
    %0 = vector.load %arg1[%c0, %c0_0] : memref<10x128xf32, #tpu.memory_space<vmem>>, vector<10x128xf32>
    %c0_1 = arith.constant 0 : index
    %c0_2 = arith.constant 0 : index
    %1 = vector.load %arg2[%c0_1, %c0_2] : memref<1x128xi32, #tpu.memory_space<vmem>>, vector<1x128xi32>
    %2 = tpu.iota {dimensions = array<i32: 0>} : vector<10x128xi32>
    %3 = vector.broadcast %1 : vector<1x128xi32> to vector<10x128xi32>
    %4 = arith.cmpi eq, %2, %3 : vector<10x128xi32>
    %cst = arith.constant 1.000000e-01 : f32
    %5 = vector.broadcast %cst : f32 to vector<10x128xf32>
    %6 = arith.subf %0, %5 : vector<10x128xf32>
    %cst_3 = arith.constant 0.000000e+00 : f32
    %7 = vector.broadcast %cst_3 : f32 to vector<10x128xf32>
    %8 = arith.select %4, %6, %7 : vector<10x128xi1>, vector<10x128xf32>
    %9 = arith.subf %8, %0 : vector<10x128xf32>
    %cst_4 = arith.constant dense<0.000000e+00> : vector<128xf32>
    %10 = vector.multi_reduction <add>, %8, %cst_4 [0] : vector<10x128xf32> to vector<128xf32>
    %11 = vector.shape_cast %10 : vector<128xf32> to vector<1x128xf32>
    %cst_5 = arith.constant 1.000000e-01 : f32
    %12 = vector.broadcast %cst_5 : f32 to vector<1x128xf32>
    %13 = arith.addf %11, %12 : vector<1x128xf32>
    %cst_6 = arith.constant dense<0xFF800000> : vector<128xf32>
    %14 = vector.multi_reduction <maximumf>, %9, %cst_6 [0] : vector<10x128xf32> to vector<128xf32>
    %15 = vector.shape_cast %14 : vector<128xf32> to vector<1x128xf32>
    %16 = vector.broadcast %15 : vector<1x128xf32> to vector<10x128xf32>
    %17 = arith.subf %9, %16 : vector<10x128xf32>
    %18 = math.exp %17 : vector<10x128xf32>
    %cst_7 = arith.constant dense<0.000000e+00> : vector<128xf32>
    %19 = vector.multi_reduction <add>, %18, %cst_7 [0] : vector<10x128xf32> to vector<128xf32>
    %20 = vector.shape_cast %19 : vector<128xf32> to vector<1x128xf32>
    %21 = math.log %20 : vector<1x128xf32>
    %22 = arith.addf %15, %21 : vector<1x128xf32>
    %23 = arith.addf %13, %22 : vector<1x128xf32>
    %c128_i32 = arith.constant 128 : i32
    %24 = arith.muli %arg0, %c128_i32 : i32
    %25 = tpu.iota {dimensions = array<i32: 1>} : vector<1x128xi32>
    %26 = vector.broadcast %24 : i32 to vector<1x128xi32>
    %27 = arith.addi %26, %25 : vector<1x128xi32>
    %c8_i32 = arith.constant 8 : i32
    %28 = vector.broadcast %c8_i32 : i32 to vector<1x128xi32>
    %29 = arith.cmpi slt, %27, %28 : vector<1x128xi32>
    %cst_8 = arith.constant 0.000000e+00 : f32
    %30 = vector.broadcast %cst_8 : f32 to vector<1x128xf32>
    %31 = arith.select %29, %23, %30 : vector<1x128xi1>, vector<1x128xf32>
    %c0_9 = arith.constant 0 : index
    %c0_10 = arith.constant 0 : index
    %32 = vector.load %arg3[%c0_9, %c0_10] : memref<1x128xf32, #tpu.memory_space<vmem>>, vector<1x128xf32>
    tpu.vector_store %arg3[%c0_9, %c0_10], %31 {strides = array<i32>} : memref<1x128xf32, #tpu.memory_space<vmem>>, vector<1x128xf32>,
    return
  }
  func.func @transform_0(%arg0: i32) -> (i32, i32) {
    %c0_i32 = arith.constant 0 : i32
    %c0_i32_0 = arith.constant 0 : i32
    return %c0_i32, %arg0 : i32, i32
  }
  func.func @transform_1(%arg0: i32) -> (i32, i32) {
    %c0_i32 = arith.constant 0 : i32
    %c0_i32_0 = arith.constant 0 : i32
    return %c0_i32, %arg0 : i32, i32
  }
  func.func @transform_2(%arg0: i32) -> (i32, i32) {
    %c0_i32 = arith.constant 0 : i32
    %c0_i32_0 = arith.constant 0 : i32
    return %c0_i32, %arg0 : i32, i32
  }
}

</mosaic_0001>

<bundles_post_ra>
// kernel: tpu_custom_call.1
= control target key start
LH: loop header
LB: loop body
LE: loop exit
PB: predicated region body
PF: predicated region fallthrough
CT: control target
= control target key end

     0   :  { %v15_v2 = vlaneseq  ;;  %s162_s0 = inlined_call_operand.vmem [shape: f32[10,8], index: 0, kind: input, shape index: {}]   ;;  %s163_s1 = inlined_call_operand.vmem [shape: s32[1,8], index: 1, kind: input, shape index: {}]   ;;  %s164_s2 = inlined_call_operand.hbm [shape: f32[1,8], index: 2, kind: output, shape index: {}]  }
   0x1   :  { %v12_v0 = vld [vmem:[%s162_s0] sm:$0xff]  ;;  %v13_v1 = vld [vmem:[%s162_s0 + $0x8] sm:$0x3] }
   0x2   :  { %v88_v3 = vld [vmem:[%s163_s1] ss:$0 sm:$0xff]  ;;  %v89_v4 = vadd.f32 -0.1, %v12_v0 }
   0x3   :  { %7 = vsyncpa [#allocation3], 0  ;;  %v16_v5 = vshrl.u32 %v15_v2, 7  ;;  %v90_v6 = vadd.f32 -0.1, %v13_v1  ;;  %vm30_vm2 = vcmask 1041408  }
   0x4   :  { %v68_v43 = vand.u32 127, %v15_v2  ;;  %s122_s0 = smov [#allocation2]  }
   0x5   :  { %v17_v7 = vadd.s32 8, %v16_v5  ;;  %vm22_vm0 = vcmp.eq.s32.totalorder %v16_v5, %v88_v3  ;;  %s80_s1 = sshll.u32 %s122_s0, 4  ;;  %s81_s1 = int_to_ptr.vmem [resolvable:$true] %s80_s1 }
   0x6   :  { %v26_v8 = vsel %vm22_vm0, %v89_v4, 0.0  ;;  %vm71_vm3 = vcmp.lt.s32.totalorder %v68_v43, 8  ;;  %s98_s15 = scalar_lea.vmem %s81_s1, 16  ;;  %s102_s16 = scalar_lea.vmem %s81_s1, 32 }
   0x7   :  { %vm23_vm1 = vcmp.eq.s32.totalorder %v17_v7, %v88_v3  ;;  %v28_v10 = vsub.f32 %v26_v8, %v12_v0  ;;  %p99_p0 = scmp.ne.s32.totalorder %s81_s1, %s98_s15  ;;  %p103_p1 = scmp.lt.s32.totalorder %s81_s1, %s81_s1 }
   0x8   :  { %v27_v9 = vsel %vm23_vm1, %v90_v6, 0.0  ;;  %p104_p2 = scmp.lt.s32.totalorder %s102_s16, %s98_s15 }
   0x9   :  { %v29_v11 = vsub.f32 %v27_v9, %v13_v1  ;;  %v31_v24 = vsel %vm30_vm2, %v27_v9, 0.0 }
   0xa   :  { %v32_v26 = vadd.f32 %v31_v24, %v26_v8  ;;  %p105_p3 = por %p104_p2, %p103_p1 }
   0xb   :  { %v40_v12 = vsel %vm30_vm2, %v29_v11, -inf }
   0xc   :  { %v41_v13 = vmax.f32 %v28_v10, %v40_v12  ;;  %v33_v30 = vrot.slane %v32_v26, 4  ;;  %p106_p4 = pnand %p105_p3, %p99_p0 }
   0xe   :  { %v42_v14 = vrot.slane %v41_v13, 4  ;;  %v34_v33 = vadd.f32 %v33_v30, %v32_v26 }
  0x10   :  { %v43_v15 = vmax.f32 %v41_v13, %v42_v14  ;;  %v35_v36 = vrot.slane %v34_v33, 2 }
  0x12   :  { %v44_v16 = vrot.slane %v43_v15, 2  ;;  %v36_v39 = vadd.f32 %v35_v36, %v34_v33 }
  0x14   :  { %v45_v17 = vmax.f32 %v43_v15, %v44_v16  ;;  %v37_v40 = vrot.slane %v36_v39, 1 }
  0x16   :  { %v46_v18 = vrot.slane %v45_v17, 1  ;;  %v38_v41 = vadd.f32 %v37_v40, %v36_v39 }
  0x18   :  { %v47_v19 = vmax.f32 %v45_v17, %v46_v18  ;;  %v39_v44 = vadd.f32 0.1, %v38_v41 }
  0x1a   :  { %v48_v20 = vsub.f32 %v28_v10, %v47_v19  ;;  %v49_v21 = vsub.f32 %v29_v11, %v47_v19 }
  0x1c   :  { %v50_v22 = vmul.f32 1.442695, %v48_v20  ;;  %v52_v23 = vmul.f32 1.442695, %v49_v21 }
  0x1e   :  { %92 = vpow2.f32 %v50_v22 }
  0x1f   :  { %94 = vpow2.f32 %v52_v23 }
  0x28   :  { %v93_v25 = vpop.eup %92 }
  0x29   :  { %v95_v27 = vpop.eup %94 }
  0x2a   :  { %v54_v28 = vsel %vm30_vm2, %v95_v27, 0.0 }
  0x2b   :  { %v55_v29 = vadd.f32 %v93_v25, %v54_v28 }
  0x2d   :  { %v56_v31 = vrot.slane %v55_v29, 4 }
  0x2f   :  { %v57_v32 = vadd.f32 %v56_v31, %v55_v29 }
  0x31   :  { %v58_v34 = vrot.slane %v57_v32, 2 }
  0x33   :  { %v59_v35 = vadd.f32 %v58_v34, %v57_v32 }
  0x35   :  { %v60_v37 = vrot.slane %v59_v35, 1 }
  0x37   :  { %v61_v38 = vadd.f32 %v60_v37, %v59_v35 }
  0x39   :  { %96 = vlog2.f32 %v61_v38 }
  0x43   :  { %v97_v42 = vpop.eup %96 }
  0x44   :  { %v63_v45 = vmul.f32 0.6931472, %v97_v42 }
  0x46   :  { %v64_v46 = vadd.f32 %v63_v45, %v47_v19 }
  0x48   :  { %v65_v47 = vadd.f32 %v64_v46, %v39_v44 }
  0x4a   :  { %v72_v48 = vsel %vm71_vm3, %v65_v47, 0.0 }
  0x4b   :  { %73 = vst [vmem:[#allocation2] sm:$0x1] %v72_v48 }
  0x4c   :  { %109 = shalt.err (!%p106_p4)
}
  0x4d   :  { %s110_s19 = scalar_lea.hbm %s164_s2, 16 }
  0x4e   :  { %p111_p5 = scmp.ne.s32.totalorder %s164_s2, %s110_s19  ;;  %p114_p6 = scmp.lt.u32.totalorder %s110_s19, %s164_s2 }
  0x50   :  { %p116_p7 = pnand %p114_p6, %p111_p5 }
  0x52   :  { %119 = shalt.err (!%p116_p7)
}
  0x53   :  { %83 = dma.vmem_to_hbm [thread:$0]  %s81_s1, 16, %s164_s2, [#allocation3]  }
  0x54   :  { %120 = dma.done.wait [#allocation3], 16  }
  0x55   :  { %121 = vsyncadd [#allocation3], 4294967280 }
  0x56   :  { %87 = vsyncpa [#allocation3], 1 }

</bundles_post_ra>
